<compile_context>
chip_gen: v7x
topology: tpu7x:2x2x1
jax: 0.10.0
libtpu: 0.0.40
codegen_flags: <defaults>
</compile_context>

<pallas_src>
import functools
import math

import jax
import jax.numpy as jnp
from jax.experimental import pallas as pl
from jax.experimental.pallas import tpu as pltpu


def _cdiv(a, b):
    return -(-a // b)


def _round_up(a, b):
    return _cdiv(a, b) * b


def _sgnn_kernel(x_ref, uw_ref, o_ref, *, compute_dtype):
    # One MXU matmul per row tile:  out_tile = X_tile @ (U @ W)
    # x_ref  : (tile_n, d)
    # uw_ref : (d, e)        fully resident (constant block index)
    # o_ref  : (tile_n, e)
    x = x_ref[...]
    uw = uw_ref[...]
    if compute_dtype is not None:
        # In-kernel cast feeds the MXU low-precision inputs (f32 accumulate)
        # with zero extra HBM traffic (no wrapper-side cast pass).
        x = x.astype(compute_dtype)
        uw = uw.astype(compute_dtype)
    o_ref[...] = jnp.dot(x, uw, preferred_element_type=jnp.float32).astype(o_ref.dtype)


def single_layer_gnn_forward(x, u, w, *, tile_n=1024, compute_dtype=None, out_dtype=None):
    """Pallas implementation of SingleLayerGNN.forward (identity activations).

    out = (X @ U) @ W.  Pass u=None for the module's frozen identity U (skips
    the O(d^2*e) U@W fold and the d*d HBM read of U); otherwise UW = U @ W is
    folded once in the wrapper so the kernel is a single matmul per row tile.
    """
    n, d = x.shape
    d2, e = w.shape
    assert d2 == d, "W must be [input_dim, embedding_dim]"

    if u is None:
        uw = w
    else:
        assert u.shape == (d, d)
        uw = jnp.dot(u, w, preferred_element_type=jnp.float32).astype(w.dtype)

    out_dtype = jnp.dtype(out_dtype) if out_dtype is not None else jnp.dtype(x.dtype)

    # ---- Row tile selection --------------------------------------------------
    # Mem-bound kernel: big tiles amortize the ~0.35us per-grid-step overhead,
    # but keep >=2 grid steps so both v7x TensorCores get work.
    tile_n = max(8, _round_up(int(tile_n), 8))
    tile_n = min(tile_n, max(8, _round_up(_cdiv(n, 2), 8)))

    x_item = jnp.dtype(x.dtype).itemsize
    w_item = jnp.dtype(uw.dtype).itemsize
    o_item = out_dtype.itemsize

    def vmem_need(t):
        # Double-buffered X tile + out tile + (constant-index, still
        # double-buffered) resident UW, plus in-kernel cast temporaries.
        need = 2 * (t * d * x_item + t * e * o_item + d * e * w_item)
        if compute_dtype is not None:
            need += t * (d + e) * jnp.dtype(compute_dtype).itemsize
        return need

    try:
        vmem_cap = int(pltpu.get_tpu_info().vmem_capacity_bytes)
    except Exception:
        vmem_cap = 64 * 1024 * 1024  # conservative fallback (v7x per-TC VMEM)
    budget = int(vmem_cap * 0.7)
    while tile_n > 8 and vmem_need(tile_n) > budget:
        tile_n = max(8, _round_up(tile_n // 2, 8))
    # TODO(synk): if d*e alone approaches the VMEM budget, switch to a K/N-tiled
    # grid with a VMEM accumulator (pl.when init/finalize) instead of resident UW.

    vmem_limit = int(min(vmem_cap - (4 << 20),
                         max(2 * vmem_need(tile_n) + (4 << 20), 16 << 20)))

    grid = (_cdiv(n, tile_n),)

    cost = pl.CostEstimate(
        flops=2 * n * d * e,
        transcendentals=0,
        bytes_accessed=n * d * x_item + d * e * w_item + n * e * o_item,
    )

    kernel = functools.partial(_sgnn_kernel, compute_dtype=compute_dtype)

    out = pl.pallas_call(
        kernel,
        out_shape=jax.ShapeDtypeStruct((n, e), out_dtype),
        grid_spec=pl.GridSpec(
            grid=grid,
            in_specs=[
                # Tile X over rows; Pallas handles the ragged last block
                # (OOB rows are never written back), so no wrapper-side padding.
                pl.BlockSpec((tile_n, d), lambda i: (i, 0)),
                # Folded UW stays fully resident (small: d x e).
                pl.BlockSpec((d, e), lambda i: (0, 0)),
            ],
            out_specs=pl.BlockSpec((tile_n, e), lambda i: (i, 0)),
        ),
        compiler_params=pltpu.CompilerParams(
            dimension_semantics=("parallel",),
            vmem_limit_bytes=vmem_limit,
        ),
        cost_estimate=cost,
    )(x, uw)
    return out


def init_params(key, input_dim, embedding_dim):
    """Deterministic re-implementation of _build_up().

    W, b: fan-in uniform init (utils.get_weight_initial); U: identity
    (requires_grad=False).  b ([1, embedding_dim]) is allocated but never used
    in forward — kept only for parity with the PyTorch module.
    """
    k_w, k_b = jax.random.split(key)
    bound = 1.0 / math.sqrt(embedding_dim)
    W = jax.random.uniform(
        k_w, (input_dim, embedding_dim), jnp.float32, minval=-bound, maxval=bound
    )
    b = jax.random.uniform(
        k_b, (1, embedding_dim), jnp.float32, minval=-bound, maxval=bound
    )  # unused in forward (parity with the PyTorch module)
    U = jnp.eye(input_dim, dtype=jnp.float32)
    return W, b, U


if __name__ == "__main__":
    key = jax.random.PRNGKey(0)
    k_x, k_p = jax.random.split(key)

    n = 64            # number of sampled nodes (batch)
    input_dim = 32
    embedding_dim = 32

    X = jax.random.normal(k_x, (n, input_dim), jnp.float32)
    W, b, U = init_params(k_p, input_dim, embedding_dim)

    # Fast path: the module's U is a frozen identity -> skip the U@W fold.
    out_identity = single_layer_gnn_forward(X, None, W)
    # General path: explicit U (exercises the wrapper-side UW fold).
    out_general = single_layer_gnn_forward(X, U, W)
    out_identity, out_general = jax.block_until_ready((out_identity, out_general))

    # Reference in plain JAX: forward = (X @ U) @ W
    ref = (X @ U) @ W
    assert out_identity.shape == (n, embedding_dim)
    assert jnp.allclose(out_identity, ref, atol=1e-4, rtol=1e-4), "identity-path mismatch"
    assert jnp.allclose(out_general, ref, atol=1e-4, rtol=1e-4), "general-path mismatch"

    print("KERNEL_OK")
</pallas_src>

<mosaic_0001>
module attributes {stable_mosaic.version = 11 : i64} {
  func.func @_sgnn_kernel(%arg0: i32, %arg1: memref<32x32xf32, #tpu.memory_space<vmem>>, %arg2: memref<32x32xf32, #tpu.memory_space<vmem>>, %arg3: memref<32x32xf32, #tpu.memory_space<vmem>>) attributes {dimension_semantics = [#tpu.dimension_semantics<parallel>], iteration_bounds = array<i64: 2>, scalar_prefetch = 0 : i64, scratch_operands = 0 : i64, tpu.core_type = #tpu.core_type<tc>, window_params = [{transform_indices = @transform_0, window_bounds = array<i64: 32, 32>}, {pipeline_mode = #tpu.pipeline_mode<synchronous>, transform_indices = @transform_1, window_bounds = array<i64: 32, 32>}, {transform_indices = @transform_2, window_bounds = array<i64: 32, 32>}]} {
    %c0 = arith.constant 0 : index
    %c0_0 = arith.constant 0 : index
    %0 = vector.load %arg1[%c0, %c0_0] : memref<32x32xf32, #tpu.memory_space<vmem>>, vector<32x32xf32>
    %c0_1 = arith.constant 0 : index
    %c0_2 = arith.constant 0 : index
    %1 = vector.load %arg2[%c0_1, %c0_2] : memref<32x32xf32, #tpu.memory_space<vmem>>, vector<32x32xf32>
    %cst = arith.constant dense<0.000000e+00> : vector<32x32xf32>
    %2 = tpu.matmul %0, %1, %cst {dimension_numbers = #tpu.dot_dimension_numbers<[1], [0], [0], [1], [0, 0, 1, 1], [], []>} : vector<32x32xf32>, vector<32x32xf32>, vector<32x32xf32> -> vector<32x32xf32>
    %c0_3 = arith.constant 0 : index
    %c0_4 = arith.constant 0 : index
    %3 = vector.load %arg3[%c0_3, %c0_4] : memref<32x32xf32, #tpu.memory_space<vmem>>, vector<32x32xf32>
    tpu.vector_store %arg3[%c0_3, %c0_4], %2 {strides = array<i32>} : memref<32x32xf32, #tpu.memory_space<vmem>>, vector<32x32xf32>,
    return
  }
  func.func @transform_0(%arg0: i32) -> (i32, i32) {
    %c0_i32 = arith.constant 0 : i32
    %c0_i32_0 = arith.constant 0 : i32
    return %arg0, %c0_i32 : i32, i32
  }
  func.func @transform_1(%arg0: i32) -> (i32, i32) {
    %c0_i32 = arith.constant 0 : i32
    %c0_i32_0 = arith.constant 0 : i32
    %c0_i32_1 = arith.constant 0 : i32
    return %c0_i32, %c0_i32_0 : i32, i32
  }
  func.func @transform_2(%arg0: i32) -> (i32, i32) {
    %c0_i32 = arith.constant 0 : i32
    %c0_i32_0 = arith.constant 0 : i32
    return %arg0, %c0_i32 : i32, i32
  }
}

</mosaic_0001>

<bundles_post_ra>
// kernel: tpu_custom_call.1
= control target key start
LH: loop header
LB: loop body
LE: loop exit
PB: predicated region body
PF: predicated region fallthrough
CT: control target
= control target key end

     0   :  { %s393_s9 = smov 0   ;;  %s430_s0 = inlined_call_operand.vmem [shape: f32[64,32], index: 0, kind: input, shape index: {}]   ;;  %s431_s1 = inlined_call_operand.vmem [shape: f32[32,32], index: 1, kind: input, shape index: {}]   ;;  %s432_s2 = inlined_call_operand.vmem [shape: f32[64,32], index: 2, kind: output, shape index: {}]  }
   0x1 LB: > { %s313_s10 = sadd.s32 4294967295, %s376_s9   ;;  %p317_p0 = scmp.ge.s32.totalorder %s376_s9, 1  ;;  %s376_s9 = sphi %s393_s9, %s12_s9  }
   0x2   : > { %p113_p1 = scmp.lt.s32.totalorder %s376_s9, 3 }
   0x4   : > { %p114_p2 = pnand %p317_p0, %p113_p1 }
   0x5   : > { %v151_v0 = vld [vmem:[%s431_s1] sm:$0xff] (!%p114_p2)  ;;  %v152_v1 = vld [vmem:[%s431_s1 + $0x8] sm:$0xff] (!%p114_p2)  ;;  %v153_v2 = vld [vmem:[%s431_s1 + $0x10] sm:$0xff] (!%p114_p2)  ;;  %s318_s17 = sshll.u32 (!%p114_p2), %s313_s10, 2  ;;  %vm155_vm0 = vcmask (!%p114_p2), 261120  }
   0x6   : > { %117 = sbr.rel (%p114_p2) target bundleno = 232 (0xe8), region = 28  ;;  %v350_v3 = vpack.c.bf16 (!%p114_p2), %v152_v1, %v151_v0  ;;  %v154_v4 = vld [vmem:[%s431_s1 + $0x18] sm:$0xff] (!%p114_p2)  ;;  %p136_p3 = scmp.lt.s32.totalorder (!%p114_p2), %s318_s17, 7 }
   0x7   : > { %v354_v5 = vpack.c.bf16 (!%p114_p2), %v154_v4, %v153_v2 }
   0x8   : > { %351 = vmatprep.subr.bf16.mxu0 (!%p114_p2), %v350_v3  ;;  %358 = vmatprep.subr.bf16.mxu1 (!%p114_p2), %v350_v3 }
   0x9   : > { %353 = vmatpush3.bf16.msra.mxu0 (!%p114_p2), %v350_v3  ;;  %360 = vmatpush3.bf16.msra.mxu1 (!%p114_p2), %v350_v3 }
   0xa   : > { %355 = vmatprep.subr.bf16.mxu0 (!%p114_p2), %v354_v5  ;;  %359 = vmatprep.subr.bf16.mxu1 (!%p114_p2), %v354_v5 }
   0xd   : > { %s434_s17 = smov (!%p136_p3, %s318_s17), 7  ;;  %357 = vmatpush3.bf16.msra.mxu0 %v354_v5  ;;  %361 = vmatpush3.bf16.msra.mxu1 %v354_v5 }
   0xe   : > { %s319_s20 = sshll.u32 %s434_s17, 3 }
   0xf   : > { %s139_s23 = scalar_lea.vmem %s430_s0, %s319_s20  ;;  %s145_s26 = scalar_lea.vmem %s432_s2, %s319_s20 }
  0x10   : > { %v147_v6 = vld [vmem:[%s139_s23] sm:$0xff]  ;;  %v149_v7 = vld [vmem:[%s139_s23 + $0x10] sm:$0xff]  ;;  %v148_v8 = vld [vmem:[%s139_s23 + $0x8] sm:$0xff] }
  0x11   : > { %v150_v9 = vld [vmem:[%s139_s23 + $0x18] sm:$0xff]  ;;  %344 = vmatprep.mubr.msk.f32.mxu0 %vm155_vm0, %v147_v6  ;;  %347 = vmatprep.mubr.msk.f32.mxu1 %vm155_vm0, %v149_v7 }
  0x12   : > { %345 = vmatmul.mubr.msk.f32.vlgmr.msra.gmra.mrb[0].mxu0 %vm155_vm0, %v148_v8  ;;  %348 = vmatmul.mubr.msk.f32.vlgmr.msra.gmra.mrb[0].mxu1 %vm155_vm0, %v150_v9 }
  0xe5   : > { %v346_v10 = vpop.f32.mrb[0].mxu0  ;;  %v349_v11 = vpop.f32.mrb[0].mxu1 }
  0xe6   : > { %v234_v12 = vpop.f32.mrb[1].mxu0  ;;  %v244_v13 = vpop.f32.mrb[1].mxu1  ;;  %254 = vst.msk [vmem:[%s145_s26 + $0x8] sm:$0xff] %vm155_vm0, %v346_v10  ;;  %256 = vst.msk [vmem:[%s145_s26 + $0x18] sm:$0xff] %vm155_vm0, %v349_v11 }
  0xe7   : > { %253 = vst.msk [vmem:[%s145_s26] sm:$0xff] %vm155_vm0, %v234_v12  ;;  %255 = vst.msk [vmem:[%s145_s26 + $0x10] sm:$0xff] %vm155_vm0, %v244_v13 }
  0xe8 PF: > { %s12_s9 = sadd.s32 1, %s376_s9  }
  0xe9   : > { %p9_p4 = scmp.ge.s32.totalorder %s12_s9, 4  }
  0xeb   :  { %11 = sbr.rel (!%p9_p4) target bundleno = 1 (0x1), region = 58 }

</bundles_post_ra>
